<compile_context>
chip_gen: v6e
topology: v6e:2x2x1
jax: 0.10.0
libtpu: 0.0.40
codegen_flags: <defaults>
</compile_context>

<pallas_src>
import functools

import jax
import jax.numpy as jnp
from jax.experimental import pallas as pl
from jax.experimental.pallas import tpu as pltpu

LANE = 128        # lane width: pad the *intermediate* hidden dim to this
_SUBLANE = 8      # sublane granularity for the batch (second-to-last) dim
_TM_MAX = 1024    # max batch-tile rows (keeps VMEM tiny even on v5e)
_SMALL_BATCH = 256  # below this, a single fused XLA op beats a kernel launch


def _round_up(n, m):
    return ((n + m - 1) // m) * m


def _mlp_kernel(x_ref, w1_ref, b1_ref, w2_ref, b2_ref, o_ref):
    # x: (TM, Hin) bf16 | w1: (Hin, HP) bf16 | b1: (1, HP) f32
    # w2: (HP, Hout) bf16 | b2: (1, Hout) f32 | o: (TM, Hout) f32
    h = jnp.dot(x_ref[...], w1_ref[...],
                preferred_element_type=jnp.float32)          # MXU
    h = jnp.maximum(h + b1_ref[...], 0.0)                    # VPU, f32
    y = jnp.dot(h.astype(jnp.bfloat16), w2_ref[...],
                preferred_element_type=jnp.float32)          # MXU
    o_ref[...] = (y + b2_ref[...]).astype(o_ref.dtype)


def prepare_params(w1, b1, w2, b2):
    """One-time (init-time) padding / bf16 cast — hoisted out of the hot path.

    Only the intermediate hidden dim is padded to 128 lanes (lane-dense h);
    the input contraction dim and the output dim stay at their real sizes.
    Handles non-square layers (no square-hidden assert).
    """
    h_in, h_mid = w1.shape
    h_mid2, h_out = w2.shape
    assert h_mid == h_mid2, "w1/w2 inner dims must match"
    hp_mid = _round_up(h_mid, LANE)

    w1_p = jnp.zeros((h_in, hp_mid), jnp.bfloat16).at[:, :h_mid].set(
        w1.astype(jnp.bfloat16))
    b1_p = jnp.zeros((1, hp_mid), jnp.float32).at[:, :h_mid].set(
        b1.reshape(1, h_mid).astype(jnp.float32))
    w2_p = jnp.zeros((hp_mid, h_out), jnp.bfloat16).at[:h_mid, :].set(
        w2.astype(jnp.bfloat16))
    b2_p = b2.reshape(1, h_out).astype(jnp.float32)
    return w1_p, b1_p, w2_p, b2_p


def _forward_pallas(x, w1_p, b1_p, w2_p, b2_p):
    B, h_in = x.shape
    hp_mid = w1_p.shape[1]
    h_out = w2_p.shape[1]

    # Batch tiling: large tiles amortize per-grid-step overhead, but keep
    # >= 2 grid steps whenever possible so ("parallel",) can shard the grid
    # across both v7x TensorCores.  TM <= 1024 keeps the double-buffered
    # working set (< ~1 MiB) far under every generation's scoped-VMEM limit
    # (v5e default 16 MiB), so no vmem_limit_bytes override is needed.
    b_pad = _round_up(B, _SUBLANE)
    tm = min(_TM_MAX, max(_SUBLANE, _round_up(pl.cdiv(b_pad, 2), _SUBLANE)))
    b_pad = _round_up(b_pad, tm)
    grid = (b_pad // tm,)

    xb = x.astype(jnp.bfloat16)
    if b_pad != B:
        xb = jnp.pad(xb, ((0, b_pad - B), (0, 0)))

    out = pl.pallas_call(
        _mlp_kernel,
        out_shape=jax.ShapeDtypeStruct((b_pad, h_out), jnp.float32),
        grid=grid,
        in_specs=[
            pl.BlockSpec((tm, h_in), lambda i: (i, 0)),       # x: batch-tiled
            pl.BlockSpec((h_in, hp_mid), lambda i: (0, 0)),   # w1: VMEM-resident
            pl.BlockSpec((1, hp_mid), lambda i: (0, 0)),      # b1: resident
            pl.BlockSpec((hp_mid, h_out), lambda i: (0, 0)),  # w2: resident
            pl.BlockSpec((1, h_out), lambda i: (0, 0)),       # b2: resident
        ],
        out_specs=pl.BlockSpec((tm, h_out), lambda i: (i, 0)),
        compiler_params=pltpu.CompilerParams(
            dimension_semantics=("parallel",)),
    )(xb, w1_p, b1_p, w2_p, b2_p)

    return out[:B] if b_pad != B else out


def wrapped_model_forward(x, params, *, force_pallas=False):
    """WrappedModel.forward(x) = model(x); model is the 2-layer MLP above.

    `params` must come from prepare_params() (pre-padded / pre-cast once).
    """
    w1_p, b1_p, w2_p, b2_p = params
    B = x.shape[0]
    if not force_pallas and B <= _SMALL_BATCH:
        # Tiny problem: one fused XLA expression beats kernel launch overhead.
        xb = x.astype(jnp.bfloat16)
        h = jnp.maximum(
            jnp.dot(xb, w1_p, preferred_element_type=jnp.float32) + b1_p, 0.0)
        return jnp.dot(h.astype(jnp.bfloat16), w2_p,
                       preferred_element_type=jnp.float32) + b2_p
    return _forward_pallas(x, w1_p, b1_p, w2_p, b2_p)


def init_params(key, hidden=32):
    # Deterministic init (PyTorch-Linear-style uniform bounds), no checkpoint.
    k1, k2, k3, k4 = jax.random.split(key, 4)
    bound = 1.0 / (hidden ** 0.5)
    w1 = jax.random.uniform(k1, (hidden, hidden), jnp.float32, -bound, bound)
    b1 = jax.random.uniform(k2, (1, hidden), jnp.float32, -bound, bound)
    w2 = jax.random.uniform(k3, (hidden, hidden), jnp.float32, -bound, bound)
    b2 = jax.random.uniform(k4, (1, hidden), jnp.float32, -bound, bound)
    return w1, b1, w2, b2


if __name__ == "__main__":
    # TODO(synk): WrappedModel wraps an unspecified `model`; a representative
    # Linear(32->32) -> ReLU -> Linear(32->32) inner model is used here.
    key = jax.random.PRNGKey(0)
    kx, kp = jax.random.split(key)

    batch, hidden = 64, 32
    x = jax.random.normal(kx, (batch, hidden), jnp.float32)
    w1, b1, w2, b2 = init_params(kp, hidden)

    params = prepare_params(w1, b1, w2, b2)  # one-time padding / bf16 cast

    # Force the Pallas path for the demo (B=64 -> TM=32, grid=(2,)).
    fwd = jax.jit(functools.partial(wrapped_model_forward, force_pallas=True))
    out = fwd(x, params)
    jax.block_until_ready(out)

    # Reference (f32); bf16 matmul operands => loose tolerance.
    ref = jnp.maximum(x @ w1 + b1, 0.0) @ w2 + b2
    assert out.shape == (batch, hidden)
    assert jnp.allclose(out, ref, atol=5e-2, rtol=5e-2), (
        float(jnp.max(jnp.abs(out - ref))))

    # Auto-dispatch path for tiny batches (pure fused jnp, no kernel launch).
    out_small = jax.jit(wrapped_model_forward)(x[:8], params)
    ref_small = jnp.maximum(x[:8] @ w1 + b1, 0.0) @ w2 + b2
    assert jnp.allclose(out_small, ref_small, atol=5e-2, rtol=5e-2)

    print("KERNEL_OK")
</pallas_src>

<mosaic_0001>
module attributes {stable_mosaic.version = 11 : i64} {
  func.func @_mlp_kernel(%arg0: i32, %arg1: memref<32x32xbf16, #tpu.memory_space<vmem>>, %arg2: memref<32x128xbf16, #tpu.memory_space<vmem>>, %arg3: memref<1x128xf32, #tpu.memory_space<vmem>>, %arg4: memref<128x32xbf16, #tpu.memory_space<vmem>>, %arg5: memref<1x32xf32, #tpu.memory_space<vmem>>, %arg6: memref<32x32xf32, #tpu.memory_space<vmem>>) attributes {dimension_semantics = [#tpu.dimension_semantics<parallel>], iteration_bounds = array<i64: 2>, scalar_prefetch = 0 : i64, scratch_operands = 0 : i64, tpu.core_type = #tpu.core_type<tc>, window_params = [{transform_indices = @transform_0, window_bounds = array<i64: 32, 32>}, {pipeline_mode = #tpu.pipeline_mode<synchronous>, transform_indices = @transform_1, window_bounds = array<i64: 32, 128>}, {pipeline_mode = #tpu.pipeline_mode<synchronous>, transform_indices = @transform_2, window_bounds = array<i64: 1, 128>}, {pipeline_mode = #tpu.pipeline_mode<synchronous>, transform_indices = @transform_3, window_bounds = array<i64: 128, 32>}, {pipeline_mode = #tpu.pipeline_mode<synchronous>, transform_indices = @transform_4, window_bounds = array<i64: 1, 32>}, {transform_indices = @transform_5, window_bounds = array<i64: 32, 32>}]} {
    %c0 = arith.constant 0 : index
    %c0_0 = arith.constant 0 : index
    %0 = vector.load %arg1[%c0, %c0_0] : memref<32x32xbf16, #tpu.memory_space<vmem>>, vector<32x32xbf16>
    %c0_1 = arith.constant 0 : index
    %c0_2 = arith.constant 0 : index
    %1 = vector.load %arg2[%c0_1, %c0_2] : memref<32x128xbf16, #tpu.memory_space<vmem>>, vector<32x128xbf16>
    %cst = arith.constant dense<0.000000e+00> : vector<32x128xf32>
    %2 = tpu.matmul %0, %1, %cst {dimension_numbers = #tpu.dot_dimension_numbers<[1], [0], [0], [1], [0, 0, 1, 1], [], []>} : vector<32x32xbf16>, vector<32x128xbf16>, vector<32x128xf32> -> vector<32x128xf32>
    %c0_3 = arith.constant 0 : index
    %c0_4 = arith.constant 0 : index
    %3 = vector.load %arg3[%c0_3, %c0_4] : memref<1x128xf32, #tpu.memory_space<vmem>>, vector<1x128xf32>
    %4 = vector.broadcast %3 : vector<1x128xf32> to vector<32x128xf32>
    %5 = arith.addf %2, %4 : vector<32x128xf32>
    %cst_5 = arith.constant 0.000000e+00 : f32
    %6 = vector.broadcast %cst_5 : f32 to vector<32x128xf32>
    %7 = arith.maximumf %5, %6 : vector<32x128xf32>
    %8 = arith.truncf %7 : vector<32x128xf32> to vector<32x128xbf16>
    %c0_6 = arith.constant 0 : index
    %c0_7 = arith.constant 0 : index
    %9 = vector.load %arg4[%c0_6, %c0_7] : memref<128x32xbf16, #tpu.memory_space<vmem>>, vector<128x32xbf16>
    %cst_8 = arith.constant dense<0.000000e+00> : vector<32x32xf32>
    %10 = tpu.matmul %8, %9, %cst_8 {dimension_numbers = #tpu.dot_dimension_numbers<[1], [0], [0], [1], [0, 0, 1, 1], [], []>} : vector<32x128xbf16>, vector<128x32xbf16>, vector<32x32xf32> -> vector<32x32xf32>
    %c0_9 = arith.constant 0 : index
    %c0_10 = arith.constant 0 : index
    %11 = vector.load %arg5[%c0_9, %c0_10] : memref<1x32xf32, #tpu.memory_space<vmem>>, vector<1x32xf32>
    %12 = vector.broadcast %11 : vector<1x32xf32> to vector<32x32xf32>
    %13 = arith.addf %10, %12 : vector<32x32xf32>
    %c0_11 = arith.constant 0 : index
    %c0_12 = arith.constant 0 : index
    %14 = vector.load %arg6[%c0_11, %c0_12] : memref<32x32xf32, #tpu.memory_space<vmem>>, vector<32x32xf32>
    tpu.vector_store %arg6[%c0_11, %c0_12], %13 {strides = array<i32>} : memref<32x32xf32, #tpu.memory_space<vmem>>, vector<32x32xf32>,
    return
  }
  func.func @transform_0(%arg0: i32) -> (i32, i32) {
    %c0_i32 = arith.constant 0 : i32
    %c0_i32_0 = arith.constant 0 : i32
    return %arg0, %c0_i32 : i32, i32
  }
  func.func @transform_1(%arg0: i32) -> (i32, i32) {
    %c0_i32 = arith.constant 0 : i32
    %c0_i32_0 = arith.constant 0 : i32
    %c0_i32_1 = arith.constant 0 : i32
    return %c0_i32, %c0_i32_0 : i32, i32
  }
  func.func @transform_2(%arg0: i32) -> (i32, i32) {
    %c0_i32 = arith.constant 0 : i32
    %c0_i32_0 = arith.constant 0 : i32
    %c0_i32_1 = arith.constant 0 : i32
    return %c0_i32, %c0_i32_0 : i32, i32
  }
  func.func @transform_3(%arg0: i32) -> (i32, i32) {
    %c0_i32 = arith.constant 0 : i32
    %c0_i32_0 = arith.constant 0 : i32
    %c0_i32_1 = arith.constant 0 : i32
    return %c0_i32, %c0_i32_0 : i32, i32
  }
  func.func @transform_4(%arg0: i32) -> (i32, i32) {
    %c0_i32 = arith.constant 0 : i32
    %c0_i32_0 = arith.constant 0 : i32
    %c0_i32_1 = arith.constant 0 : i32
    return %c0_i32, %c0_i32_0 : i32, i32
  }
  func.func @transform_5(%arg0: i32) -> (i32, i32) {
    %c0_i32 = arith.constant 0 : i32
    %c0_i32_0 = arith.constant 0 : i32
    return %arg0, %c0_i32 : i32, i32
  }
}

</mosaic_0001>

<bundles_post_ra>
// kernel: wrapped_model_forward.1
= control target key start
LH: loop header
LB: loop body
LE: loop exit
PB: predicated region body
PF: predicated region fallthrough
CT: control target
= control target key end

     0   :  { %s635_s18 = smov 0   ;;  %s698_s0 = inlined_call_operand.vmem [shape: bf16[64,32], index: 0, kind: input, shape index: {}]   ;;  %s699_s1 = inlined_call_operand.vmem [shape: bf16[32,128], index: 1, kind: input, shape index: {}]   ;;  %s700_s2 = inlined_call_operand.vmem [shape: f32[1,128], index: 2, kind: input, shape index: {}]   ;;  %s701_s3 = inlined_call_operand.vmem [shape: bf16[128,32], index: 3, kind: input, shape index: {}]   ;;  %s702_s4 = inlined_call_operand.vmem [shape: f32[1,32], index: 4, kind: input, shape index: {}]   ;;  %s703_s5 = inlined_call_operand.vmem [shape: f32[64,32], index: 5, kind: output, shape index: {}]  }
   0x1 LB: > { %s508_s19 = sadd.s32 4294967295, %s603_s18   ;;  %p512_p0 = scmp.ge.s32.totalorder %s603_s18, 1  ;;  %s603_s18 = sphi %s635_s18, %s15_s18  }
   0x2   : > { %p188_p1 = scmp.lt.s32.totalorder %s603_s18, 3 }
   0x4   : > { %p189_p2 = pnand %p512_p0, %p188_p1 }
   0x5   : > { %s513_s22 = sshll.u32 (!%p189_p2), %s508_s19, 2 }
   0x6   : > { %192 = sbr.rel (%p189_p2) target bundleno = 428 (0x1ac), region = 40  ;;  %p217_p3 = scmp.lt.s32.totalorder (!%p189_p2), %s513_s22, 7 }
   0xb   : > { %v585_v0 = vld [vmem:[%s699_s1 + $0x8] sm:$0xff]   ;;  %v586_v1 = vld [vmem:[%s699_s1] sm:$0xff]   ;;  %v589_v2 = vld [vmem:[%s701_s3 + $0x38] sm:$0xff]   ;;  %s705_s22 = smov (!%p217_p3, %s513_s22), 7  ;;  %vm266_vm0 = vcmask 261120  }
   0xc   : > { %549 = vmatprep.subr.bf16.mxu0 %v585_v0  ;;  %v590_v3 = vld [vmem:[%s701_s3 + $0x30] sm:$0xff]   ;;  %557 = vmatprep.subr.bf16.mxu1 %v589_v2  ;;  %s514_s29 = sshll.u32 %s705_s22, 2  ;;  %v591_v4 = vld [vmem:[%s701_s3 + $0x28] sm:$0xff]   ;;  %v592_v7 = vld [vmem:[%s701_s3 + $0x20] sm:$0xff]   ;;  %s516_s24 = sshll.u32 %s705_s22, 3 }
   0xd   : > { %550 = vmatpush3.bf16.msra.mxu0 %v585_v0  ;;  %558 = vmatpush3.bf16.msra.mxu1 %v589_v2  ;;  %s220_s7 = scalar_lea.vmem %s698_s0, %s514_s29  ;;  %v593_v8 = vld [vmem:[%s701_s3 + $0x18] sm:$0xff]   ;;  %v594_v9 = vld [vmem:[%s701_s3 + $0x10] sm:$0xff]   ;;  %v595_v10 = vld [vmem:[%s701_s3 + $0x8] sm:$0xff]   ;;  %s226_s29 = scalar_lea.vmem %s703_s5, %s516_s24 }
   0xe   : > { %551 = vmatprep.subr.bf16.mxu0 %v586_v1  ;;  %559 = vmatprep.subr.bf16.mxu1 %v590_v3  ;;  %v587_v5 = vld [vmem:[%s220_s7] sm:$0xff]   ;;  %v588_v6 = vld [vmem:[%s220_s7 + $0x8] sm:$0xff]  }
   0xf   : > { %553 = vmatprep.mubr.msk.bf16.mxu0 %vm266_vm0, %v587_v5  ;;  %v596_v11 = vld [vmem:[%s701_s3] sm:$0xff]  }
  0x10   : > { %v517_v14 = vld [vmem:[%s700_s2] ss:$0 sm:$0xff] }
  0x11   : > { %552 = vmatpush3.bf16.msra.mxu0 %v586_v1  ;;  %560 = vmatpush3.bf16.msra.mxu1 %v590_v3  ;;  %v524_v28 = vld [vmem:[%s702_s4] ss:$0 sm:$0xff] }
  0x12   : > { %561 = vmatprep.subr.bf16.mxu1 %v591_v4 }
  0x14   : > { %554 = vmatmul.mubr.msk.bf16.vlgmr.msra.gmra.mxu0 %vm266_vm0, %v588_v6 }
  0x15   : > { %562 = vmatpush3.bf16.msra.mxu1 %v591_v4 }
  0x16   : > { %563 = vmatprep.subr.bf16.mxu1 %v592_v7 }
  0x19   : > { %564 = vmatpush3.bf16.msra.mxu1 %v592_v7 }
  0x1a   : > { %565 = vmatprep.subr.bf16.mxu1 %v593_v8 }
  0x1d   : > { %566 = vmatpush3.bf16.msra.mxu1 %v593_v8 }
  0x1e   : > { %567 = vmatprep.subr.bf16.mxu1 %v594_v9 }
  0x21   : > { %568 = vmatpush3.bf16.msra.mxu1 %v594_v9 }
  0x22   : > { %569 = vmatprep.subr.bf16.mxu1 %v595_v10 }
  0x25   : > { %570 = vmatpush3.bf16.msra.mxu1 %v595_v10 }
  0x26   : > { %571 = vmatprep.subr.bf16.mxu1 %v596_v11 }
  0x29   : > { %572 = vmatpush3.bf16.msra.mxu1 %v596_v11 }
  0xd4   : > { %v555_v12 = vpop.f32.mrf.mxu0 }
  0xd5   : > { %v316_v18 = vadd.f32 %v555_v12, %v517_v14 }
  0xd6   : > { %v307_v13 = vpop.f32.mrf.mxu0 }
  0xd7   : > { %v308_v16 = vadd.f32 %v517_v14, %v307_v13  ;;  %v324_v24 = vmax.f32 %v316_v18, 0.0 }
  0xd8   : > { %v556_v15 = vpop.f32.mrf.mxu0 }
  0xd9   : > { %v319_v17 = vadd.f32 %v556_v15, %v517_v14  ;;  %v322_v22 = vmax.f32 %v308_v16, 0.0 }
  0xda   : > { %v310_v19 = vpop.f32.mrf.mxu0 }
  0xdb   : > { %v311_v20 = vadd.f32 %v517_v14, %v310_v19  ;;  %v325_v21 = vmax.f32 %v319_v17, 0.0 }
  0xdd   : > { %v323_v23 = vmax.f32 %v311_v20, 0.0  ;;  %v327_v26 = vpack.c.bf16 %v325_v21, %v324_v24 }
  0xdf   : > { %v326_v25 = vpack.c.bf16 %v323_v23, %v322_v22 }
  0xe1   : > { %573 = vmatprep.mubr.bf16.mxu1 %v326_v25 }
  0xe2   : > { %574 = vmatmul.mubr.bf16.vlgmr.msra.gmra.mxu1 %v327_v26 }
 0x1a2   : > { %v575_v27 = vpop.f32.mrf.mxu1 }
 0x1a3   : > { %v442_v34 = vadd.f32 %v575_v27, %v524_v28 }
 0x1a4   : > { %v433_v29 = vpop.f32.mrf.mxu1 }
 0x1a5   : > { %v434_v30 = vadd.f32 %v524_v28, %v433_v29  ;;  %450 = vst.msk [vmem:[%s226_s29 + $0x10] sm:$0xff] %vm266_vm0, %v442_v34 }
 0x1a6   : > { %v576_v31 = vpop.f32.mrf.mxu1 }
 0x1a7   : > { %448 = vst.msk [vmem:[%s226_s29] sm:$0xff] %vm266_vm0, %v434_v30  ;;  %v445_v35 = vadd.f32 %v576_v31, %v524_v28 }
 0x1a8   : > { %v436_v32 = vpop.f32.mrf.mxu1 }
 0x1a9   : > { %v437_v33 = vadd.f32 %v524_v28, %v436_v32  ;;  %451 = vst.msk [vmem:[%s226_s29 + $0x18] sm:$0xff] %vm266_vm0, %v445_v35 }
 0x1ab   : > { %449 = vst.msk [vmem:[%s226_s29 + $0x8] sm:$0xff] %vm266_vm0, %v437_v33 }
 0x1ac PF: > { %s15_s18 = sadd.s32 1, %s603_s18  }
 0x1ad   : > { %p12_p4 = scmp.ge.s32.totalorder %s15_s18, 4  }
 0x1af   :  { %14 = sbr.rel (!%p12_p4) target bundleno = 1 (0x1), region = 70 }

</bundles_post_ra>
